<compile_context>
chip_gen: v7x
topology: tpu7x:2x2x1
jax: 0.10.0
libtpu: 0.0.40
codegen_flags: <defaults>
</compile_context>

<pallas_src>
import jax
import jax.numpy as jnp
from jax.experimental import pallas as pl
from jax.experimental.pallas import tpu as pltpu

_LANES = 128       # TPU lane width (fast axis)
_SUBLANES = 8      # sublane granularity; block row counts must be multiples of 8
_SMALL_N = _SUBLANES * _LANES  # below one minimal tile -> pure-jnp fallback


def _max_tile_rows() -> int:
    """Largest tile row-count per chip generation.

    VMEM need = 5 streams (3 in + 2 out) x 2 buffers x tile bytes:
      v5e      : (2048,128) f32 = 1 MiB/stream -> 10 MiB  (< 16 MiB default scoped VMEM)
      v6e/v7x  : (4096,128) f32 = 2 MiB/stream -> 20 MiB  (< 32 MiB default scoped VMEM)
    """
    try:
        kind = jax.devices()[0].device_kind.lower()
    except Exception:
        return 2048
    if ("v6" in kind) or ("v7" in kind) or ("7x" in kind):
        return 4096
    return 2048


def _relu_bounds_math(lb, ub, alpha):
    """DeepPoly ReLU bound propagation (elementwise; matches the PyTorch module)."""
    clamped_alpha = jnp.clip(alpha, 0.0, 1.0)           # torch.clamp(alpha, 0, 1)
    slope = jnp.maximum(ub / (ub - lb), 0.0)            # torch.clamp(..., min=0)
    uc_bias = jnp.where(lb > 0, 0.0, -(slope * lb))
    uc_diag = jnp.where(lb > 0, 1.0, slope)             # diag entries of uc
    lc_diag = jnp.where(ub < 0, 0.0, clamped_alpha)     # diag entries of lc
    new_lb = lb * lc_diag                                # lc_bias == 0 (dropped)
    new_ub = ub * uc_diag + uc_bias                      # == ub @ diag(uc_diag) + uc_bias
    return new_lb, new_ub


def verify_relu_kernel(lb_ref, ub_ref, alpha_ref, lb_out_ref, ub_out_ref):
    new_lb, new_ub = _relu_bounds_math(lb_ref[...], ub_ref[...], alpha_ref[...])
    lb_out_ref[...] = new_lb
    ub_out_ref[...] = new_ub


@jax.jit
def verify_relu_forward(lb, ub, alpha):
    """lb, ub, alpha: float32 vectors of shape (N,). Returns (new_lb, new_ub)."""
    n = lb.shape[0]

    # Tiny problems: a fused XLA elementwise expression beats kernel launch + DMA setup.
    if n <= _SMALL_N:
        return _relu_bounds_math(lb, ub, alpha)

    # Pad only to the next multiple of 128 lanes (and only if needed).
    pad = (-n) % _LANES
    if pad:
        # Fill values chosen so slope = ub/(ub-lb) is finite in the padded lanes.
        lb_p = jnp.pad(lb, (0, pad), constant_values=-1.0)
        ub_p = jnp.pad(ub, (0, pad), constant_values=1.0)
        a_p = jnp.pad(alpha, (0, pad), constant_values=0.0)
    else:
        lb_p, ub_p, a_p = lb, ub, alpha

    rows = (n + pad) // _LANES
    lb2 = lb_p.reshape(rows, _LANES)
    ub2 = ub_p.reshape(rows, _LANES)
    a2 = a_p.reshape(rows, _LANES)

    # Split into at least 2 grid steps so both v7x TensorCores are used
    # (negligible cost on 1-TC chips), then cap per-generation for VMEM.
    half_rows = -(-rows // 2)
    tile_rows = -(-half_rows // _SUBLANES) * _SUBLANES   # round up to sublane multiple
    tile_rows = max(_SUBLANES, min(_max_tile_rows(), tile_rows))

    # rows need NOT be divisible by tile_rows: Pallas handles the partial last
    # block (out-of-range reads padded, out-of-range stores dropped).
    grid = (pl.cdiv(rows, tile_rows),)
    spec = pl.BlockSpec((tile_rows, _LANES), lambda i: (i, 0))

    out_lb, out_ub = pl.pallas_call(
        verify_relu_kernel,
        grid=grid,
        in_specs=[spec, spec, spec],
        out_specs=[spec, spec],
        out_shape=[
            jax.ShapeDtypeStruct((rows, _LANES), jnp.float32),
            jax.ShapeDtypeStruct((rows, _LANES), jnp.float32),
        ],
        compiler_params=pltpu.CompilerParams(
            dimension_semantics=("parallel",),  # v7x: shard row-tiles across both TCs
        ),
    )(lb2, ub2, a2)

    out_lb = out_lb.reshape(rows * _LANES)
    out_ub = out_ub.reshape(rows * _LANES)
    if pad:
        out_lb = out_lb[:n]
        out_ub = out_ub[:n]
    return out_lb, out_ub


def init_alpha_seesaw(lb, ub):
    # init_parameters(..., method='seesaw'): (ub > -lb).float()  (deterministic)
    return (ub > -lb).astype(jnp.float32)


if __name__ == "__main__":
    key = jax.random.PRNGKey(0)

    def make_bounds(k, n):
        k1, k2 = jax.random.split(k)
        lb = jax.random.uniform(k1, (n,), jnp.float32, minval=-1.0, maxval=1.0)
        ub = lb + jax.random.uniform(k2, (n,), jnp.float32, minval=0.1, maxval=2.0)
        return lb, ub

    # 4096: multiple of 128, 2 full tiles (kernel path)
    # 2500: not a multiple of 128 -> pad + partial last tile (kernel path)
    # 256 : small-N pure-jnp fallback path
    ok = True
    for i, n in enumerate([4096, 2500, 256]):
        lb, ub = make_bounds(jax.random.fold_in(key, i), n)
        # Module lazily initializes alpha on first forward with method='seesaw'.
        alpha = init_alpha_seesaw(lb, ub)

        new_lb, new_ub = verify_relu_forward(lb, ub, alpha)
        jax.block_until_ready((new_lb, new_ub))

        ref_lb, ref_ub = _relu_bounds_math(lb, ub, alpha)
        ok = ok and bool(jnp.allclose(new_lb, ref_lb, atol=1e-6))
        ok = ok and bool(jnp.allclose(new_ub, ref_ub, atol=1e-6))

    assert ok
    print("KERNEL_OK")
</pallas_src>

<mosaic_0001>
module attributes {stable_mosaic.version = 11 : i64} {
  func.func @verify_relu_kernel(%arg0: i32, %arg1: memref<16x128xf32, #tpu.memory_space<vmem>>, %arg2: memref<16x128xf32, #tpu.memory_space<vmem>>, %arg3: memref<16x128xf32, #tpu.memory_space<vmem>>, %arg4: memref<16x128xf32, #tpu.memory_space<vmem>>, %arg5: memref<16x128xf32, #tpu.memory_space<vmem>>) attributes {dimension_semantics = [#tpu.dimension_semantics<parallel>], iteration_bounds = array<i64: 2>, scalar_prefetch = 0 : i64, scratch_operands = 0 : i64, tpu.core_type = #tpu.core_type<tc>, window_params = [{transform_indices = @transform_0, window_bounds = array<i64: 16, 128>}, {transform_indices = @transform_1, window_bounds = array<i64: 16, 128>}, {transform_indices = @transform_2, window_bounds = array<i64: 16, 128>}, {transform_indices = @transform_3, window_bounds = array<i64: 16, 128>}, {transform_indices = @transform_4, window_bounds = array<i64: 16, 128>}]} {
    %c0 = arith.constant 0 : index
    %c0_0 = arith.constant 0 : index
    %0 = vector.load %arg1[%c0, %c0_0] : memref<16x128xf32, #tpu.memory_space<vmem>>, vector<16x128xf32>
    %c0_1 = arith.constant 0 : index
    %c0_2 = arith.constant 0 : index
    %1 = vector.load %arg2[%c0_1, %c0_2] : memref<16x128xf32, #tpu.memory_space<vmem>>, vector<16x128xf32>
    %c0_3 = arith.constant 0 : index
    %c0_4 = arith.constant 0 : index
    %2 = vector.load %arg3[%c0_3, %c0_4] : memref<16x128xf32, #tpu.memory_space<vmem>>, vector<16x128xf32>
    %cst = arith.constant 0.000000e+00 : f32
    %cst_5 = arith.constant 1.000000e+00 : f32
    %3 = vector.broadcast %cst : f32 to vector<16x128xf32>
    %4 = arith.maximumf %3, %2 : vector<16x128xf32>
    %5 = vector.broadcast %cst_5 : f32 to vector<16x128xf32>
    %6 = arith.minimumf %5, %4 : vector<16x128xf32>
    %7 = arith.subf %1, %0 : vector<16x128xf32>
    %8 = arith.divf %1, %7 : vector<16x128xf32>
    %cst_6 = arith.constant 0.000000e+00 : f32
    %9 = vector.broadcast %cst_6 : f32 to vector<16x128xf32>
    %10 = arith.maximumf %8, %9 : vector<16x128xf32>
    %cst_7 = arith.constant 0.000000e+00 : f32
    %11 = vector.broadcast %cst_7 : f32 to vector<16x128xf32>
    %12 = arith.cmpf ogt, %0, %11 : vector<16x128xf32>
    %13 = arith.mulf %10, %0 : vector<16x128xf32>
    %cst_8 = arith.constant 0.000000e+00 : f32
    %14 = vector.broadcast %cst_8 : f32 to vector<16x128xf32>
    %15 = arith.subf %14, %13 : vector<16x128xf32>
    %cst_9 = arith.constant 0.000000e+00 : f32
    %16 = vector.broadcast %cst_9 : f32 to vector<16x128xf32>
    %17 = arith.select %12, %16, %15 : vector<16x128xi1>, vector<16x128xf32>
    %cst_10 = arith.constant 0.000000e+00 : f32
    %18 = vector.broadcast %cst_10 : f32 to vector<16x128xf32>
    %19 = arith.cmpf ogt, %0, %18 : vector<16x128xf32>
    %cst_11 = arith.constant 1.000000e+00 : f32
    %20 = vector.broadcast %cst_11 : f32 to vector<16x128xf32>
    %21 = arith.select %19, %20, %10 : vector<16x128xi1>, vector<16x128xf32>
    %cst_12 = arith.constant 0.000000e+00 : f32
    %22 = vector.broadcast %cst_12 : f32 to vector<16x128xf32>
    %23 = arith.cmpf olt, %1, %22 : vector<16x128xf32>
    %cst_13 = arith.constant 0.000000e+00 : f32
    %24 = vector.broadcast %cst_13 : f32 to vector<16x128xf32>
    %25 = arith.select %23, %24, %6 : vector<16x128xi1>, vector<16x128xf32>
    %26 = arith.mulf %0, %25 : vector<16x128xf32>
    %27 = arith.mulf %1, %21 : vector<16x128xf32>
    %28 = arith.addf %27, %17 : vector<16x128xf32>
    %c0_14 = arith.constant 0 : index
    %c0_15 = arith.constant 0 : index
    %29 = vector.load %arg4[%c0_14, %c0_15] : memref<16x128xf32, #tpu.memory_space<vmem>>, vector<16x128xf32>
    tpu.vector_store %arg4[%c0_14, %c0_15], %26 {strides = array<i32>} : memref<16x128xf32, #tpu.memory_space<vmem>>, vector<16x128xf32>,
    %c0_16 = arith.constant 0 : index
    %c0_17 = arith.constant 0 : index
    %30 = vector.load %arg5[%c0_16, %c0_17] : memref<16x128xf32, #tpu.memory_space<vmem>>, vector<16x128xf32>
    tpu.vector_store %arg5[%c0_16, %c0_17], %28 {strides = array<i32>} : memref<16x128xf32, #tpu.memory_space<vmem>>, vector<16x128xf32>,
    return
  }
  func.func @transform_0(%arg0: i32) -> (i32, i32) {
    %c0_i32 = arith.constant 0 : i32
    %c0_i32_0 = arith.constant 0 : i32
    return %arg0, %c0_i32 : i32, i32
  }
  func.func @transform_1(%arg0: i32) -> (i32, i32) {
    %c0_i32 = arith.constant 0 : i32
    %c0_i32_0 = arith.constant 0 : i32
    return %arg0, %c0_i32 : i32, i32
  }
  func.func @transform_2(%arg0: i32) -> (i32, i32) {
    %c0_i32 = arith.constant 0 : i32
    %c0_i32_0 = arith.constant 0 : i32
    return %arg0, %c0_i32 : i32, i32
  }
  func.func @transform_3(%arg0: i32) -> (i32, i32) {
    %c0_i32 = arith.constant 0 : i32
    %c0_i32_0 = arith.constant 0 : i32
    return %arg0, %c0_i32 : i32, i32
  }
  func.func @transform_4(%arg0: i32) -> (i32, i32) {
    %c0_i32 = arith.constant 0 : i32
    %c0_i32_0 = arith.constant 0 : i32
    return %arg0, %c0_i32 : i32, i32
  }
}

</mosaic_0001>

<bundles_post_ra>
// kernel: verify_relu_forward.1
= control target key start
LH: loop header
LB: loop body
LE: loop exit
PB: predicated region body
PF: predicated region fallthrough
CT: control target
= control target key end

     0   :  { %s1189_s0 = inlined_call_operand.hbm [shape: f32[32,128], index: 0, kind: input, shape index: {}]   ;;  %s1190_s1 = inlined_call_operand.hbm [shape: f32[32,128], index: 1, kind: input, shape index: {}]   ;;  %s1191_s2 = inlined_call_operand.hbm [shape: f32[32,128], index: 2, kind: input, shape index: {}]   ;;  %s1192_s3 = inlined_call_operand.hbm [shape: f32[32,128], index: 3, kind: output, shape index: {0}]   ;;  %s1193_s4 = inlined_call_operand.hbm [shape: f32[32,128], index: 4, kind: output, shape index: {1}]  }
   0x1   :  { %1200 = sst [smem:[#allocation15_spill]] %s1189_s0 }
   0x2   :  { %1201 = sst [smem:[#allocation16_spill]] %s1190_s1 }
   0x3   :  { %10 = vsyncpa [#allocation3], 0 }
   0x4   :  { %12 = vsyncpa [#allocation3 + $0x1], 0 }
   0x5   :  { %13 = vsyncpa [#allocation6], 0 }
   0x6   :  { %15 = vsyncpa [#allocation6 + $0x1], 0 }
   0x7   :  { %16 = vsyncpa [#allocation4], 0 }
   0x8   :  { %18 = vsyncpa [#allocation4 + $0x1], 0 }
   0x9   :  { %19 = vsyncpa [#allocation10], 0 }
   0xa   :  { %21 = vsyncpa [#allocation10 + $0x1], 0  ;;  %s862_s15 = smov 0   ;;  %s864_s16 = smov 0  }
   0xb   :  { %s866_s17 = smov 0   ;;  %s868_s18 = smov 0  }
   0xc LB: > { %s883_s19 = sadd.s32 4294967295, %s826_s18   ;;  %s534_s20 = sadd.s32 4294967294, %s826_s18   ;;  %s826_s18 = sphi %s868_s18, %s1221_s18   ;;  %s822_s17 = sphi %s866_s17, %s1220_s17   ;;  %s818_s16 = sphi %s864_s16, %s1219_s16   ;;  %s814_s15 = sphi %s862_s15, %s1218_s15  }
   0xd   : > { %s887_s21 = sadd.s32 1, %s826_s18   ;;  %s34_s22 = sadd.s32 1, %s822_s17 }
   0xe   : > { %s31_s23 = ssub.s32 %s826_s18, %s887_s21  ;;  %p41_p0 = scmp.ne.s32.totalorder %s822_s17, %s818_s16 }
   0xf   : > { %p32_p1 = scmp.eq.s32.totalorder %s31_s23, 0  ;;  %p42_p2 = scmp.eq.s32.totalorder %s826_s18, 0 }
  0x10   : > { %p47_p3 = scmp.ne.s32.totalorder %s818_s16, %s814_s15  ;;  %p48_p4 = scmp.eq.s32.totalorder %s883_s19, 0 }
  0x11   : > { %s899_s24 = scalar_select %p32_p1, %s822_s17, %s34_s22  }
  0x12   : > { %p43_p5 = por %p42_p2, %p41_p0  ;;  %p901_p6 = por %p48_p4, %p47_p3 }
  0x13   : > { %p123_p7 = scmp.eq.s32.totalorder %s883_s19, 1  ;;  %p129_p8 = scmp.eq.s32.totalorder %s534_s20, 1 }
  0x14   : > { %s1202_s25 = scalar_select %p901_p6, 1, 0 }
  0x15   : > { %p592_p10 = scmp.lt.s32.totalorder %s826_s18, 2  ;;  %p908_p11 = por %p123_p7, %p41_p0 }
  0x16   : > { %p912_p12 = por %p129_p8, %p47_p3  ;;  %s175_s28 = sand.u32 1, %s822_s17  }
  0x17   : > { %s1203_s26 = scalar_select %p908_p11, 1, 0 }
  0x18   : > { %s1204_s27 = scalar_select %p912_p12, 1, 0 }
  0x19   : > { %s918_s29 = sshll.u32 %s826_s18, 8  ;;  %s922_s30 = sshll.u32 %s175_s28, 4 }
  0x1a   : > { %p924_p13 = pnand %p592_p10, %p43_p5  ;;  %s196_s6 = sand.u32 1, %s826_s18  }
  0x1b   : > { %s1206_s1 = sld [smem:[#allocation16_spill]]  ;;  %s200_s10 = scalar_lea.vmem [#allocation5], %s922_s30 }
  0x1c   : > { %s207_s11 = sshll.u32 %s200_s10, 4  ;;  %s939_s12 = scalar_lea.sflag [#allocation6], %s196_s6  ;;  %s936_s11 = int_to_ptr.vmem [resolvable:$true] %s207_s11 }
  0x1d   : > { %p945_p2 = pneg %p924_p13 }
  0x21   : > { %s933_s9 = scalar_lea.hbm %s1206_s1, %s918_s29  ;;  %s639_s23 = scalar_lea.hbm %s1206_s1, 512 }
  0x22   : > { %s634_s13 = scalar_lea.hbm %s933_s9, 256  ;;  %p640_p5 = scmp.lt.u32.totalorder %s933_s9, %s1206_s1 }
  0x23   : > { %p635_p1 = scmp.ne.s32.totalorder %s933_s9, %s634_s13  ;;  %p641_p7 = scmp.lt.u32.totalorder %s639_s23, %s634_s13 }
  0x24   : > { %p643_p10 = scmp.lt.u32.totalorder %s634_s13, %s933_s9 }
  0x25   : > { %p637_p3 = pnand %p945_p2, %p635_p1  ;;  %p642_p8 = por %p641_p7, %p640_p5 }
  0x27   : > { %p638_p4 = pneg %p637_p3  ;;  %p644_p9 = por %p643_p10, %p642_p8 }
  0x29   : > { %p645_p0 = pnand %p644_p9, %p638_p4 }
  0x2b   : > { %648 = shalt.err (!%p645_p0)
}
  0x2c   : > { %s649_s6 = scalar_lea.vmem %s936_s11, 256  ;;  %s828_s10 = smov [#allocation5]  }
  0x2d   : > { %p650_p1 = scmp.ne.s32.totalorder %s936_s11, %s649_s6  ;;  %s654_s20 = sshll.u32 %s828_s10, 4  ;;  %s655_s20 = int_to_ptr.vmem [resolvable:$false] %s654_s20 }
  0x2e   : > { %s656_s22 = scalar_lea.vmem %s655_s20, 512  ;;  %p657_p11 = scmp.lt.s32.totalorder %s936_s11, %s655_s20 }
  0x2f   : > { %p652_p3 = pnand %p650_p1, %p945_p2  ;;  %p658_p6 = scmp.lt.s32.totalorder %s656_s22, %s649_s6 }
  0x31   : > { %p653_p12 = pneg %p652_p3  ;;  %p659_p5 = por %p658_p6, %p657_p11 }
  0x33   : > { %p660_p7 = pnand %p659_p5, %p653_p12 }
  0x35   : > { %663 = shalt.err (!%p660_p7)
}
  0x36   : > { %s1196_s13 = smov 128   ;;  %s1198_s23 = smov 8  }
  0x37   : > { %581 = dma.hbm_to_vmem [thread:$0]  (!%p924_p13), %s933_s9, 256, %s936_s11, %s939_s12, %s1196_s13, %s1196_s13, %s1198_s23  }
  0x38   : > { %p236_p6 = scmp.lt.s32.totalorder %s826_s18, 3  ;;  %s1208_s0 = sld [smem:[#allocation15_spill]] }
  0x39   : > { %p1209_p9 = scmp.ge.s32.totalorder %s826_s18, 1  ;;  %s179_s20 = scalar_lea.vmem [#allocation2], %s922_s30 }
  0x3a   : > { %s186_s22 = sshll.u32 %s179_s20, 4  ;;  %s990_s9 = scalar_lea.sflag [#allocation3], %s175_s28  ;;  %s986_s22 = int_to_ptr.vmem [resolvable:$true] %s186_s22 }
  0x3b   : > { %p981_p11 = pnand %p1209_p9, %p236_p6 }
  0x3d   : > { %s1210_s10 = scalar_select %p981_p11, 1, 0 }
  0x3e   : > { %s977_s6 = scalar_lea.hbm %s1208_s0, %s918_s29  ;;  %s669_s13 = scalar_lea.hbm %s1208_s0, 512 }
  0x3f   : > { %s664_s11 = scalar_lea.hbm %s977_s6, 256  ;;  %p670_p8 = scmp.lt.u32.totalorder %s977_s6, %s1208_s0 }
  0x40   : > { %p665_p12 = scmp.ne.s32.totalorder %s977_s6, %s664_s11  ;;  %p671_p10 = scmp.lt.u32.totalorder %s669_s13, %s664_s11 }
  0x41   : > { %p673_p3 = scmp.lt.u32.totalorder %s664_s11, %s977_s6 }
  0x42   : > { %p667_p0 = pnand %p665_p12, %p945_p2  ;;  %p672_p1 = por %p671_p10, %p670_p8 }
  0x44   : > { %p668_p4 = pneg %p667_p0  ;;  %p674_p5 = por %p673_p3, %p672_p1 }
  0x46   : > { %p675_p7 = pnand %p674_p5, %p668_p4 }
  0x48   : > { %678 = shalt.err (!%p675_p7)
}
  0x49   : > { %s679_s28 = scalar_lea.vmem %s986_s22, 256  ;;  %s831_s20 = smov [#allocation2]  }
  0x4a   : > { %p680_p6 = scmp.ne.s32.totalorder %s986_s22, %s679_s28  ;;  %s684_s7 = sshll.u32 %s831_s20, 4  ;;  %s685_s7 = int_to_ptr.vmem [resolvable:$false] %s684_s7 }
  0x4b   : > { %s686_s1 = scalar_lea.vmem %s685_s7, 512  ;;  %p687_p0 = scmp.lt.s32.totalorder %s986_s22, %s685_s7 }
  0x4c   : > { %p682_p9 = pnand %p680_p6, %p945_p2  ;;  %p688_p11 = scmp.lt.s32.totalorder %s686_s1, %s679_s28 }
  0x4e   : > { %p683_p12 = pneg %p682_p9  ;;  %p689_p8 = por %p688_p11, %p687_p0 }
  0x50   : > { %p690_p10 = pnand %p689_p8, %p683_p12 }
  0x52   : > { %693 = shalt.err (!%p690_p10)
}
  0x53   : > { %s1211_s13 = smov 8   ;;  %s1212_s23 = smov 128  }
  0x54   : > { %578 = dma.hbm_to_vmem [thread:$0]  (!%p924_p13), %s977_s6, 256, %s986_s22, %s990_s9, %s1212_s23, %s1212_s23, %s1211_s13  }
  0x55   : > { %s1021_s20 = scalar_lea.hbm %s1191_s2, %s918_s29  ;;  %s221_s28 = scalar_lea.vmem [#allocation7], %s922_s30 }
  0x56   : > { %s228_s7 = sshll.u32 %s221_s28, 4  ;;  %s694_s1 = scalar_lea.hbm %s1021_s20, 256  ;;  %s1024_s7 = int_to_ptr.vmem [resolvable:$true] %s228_s7 }
  0x57   : > { %p695_p11 = scmp.ne.s32.totalorder %s1021_s20, %s694_s1  ;;  %s699_s22 = scalar_lea.hbm %s1191_s2, 512 }
  0x58   : > { %p700_p3 = scmp.lt.u32.totalorder %s1021_s20, %s1191_s2  ;;  %p701_p5 = scmp.lt.u32.totalorder %s699_s22, %s694_s1 }
  0x59   : > { %p697_p4 = pnand %p695_p11, %p945_p2  ;;  %p703_p6 = scmp.lt.u32.totalorder %s694_s1, %s1021_s20 }
  0x5a   : > { %p702_p7 = por %p701_p5, %p700_p3 }
  0x5b   : > { %p698_p1 = pneg %p697_p4 }
  0x5c   : > { %p704_p9 = por %p703_p6, %p702_p7 }
  0x5e   : > { %p705_p12 = pnand %p704_p9, %p698_p1 }
  0x60   : > { %708 = shalt.err (!%p705_p12)
}
  0x61   : > { %s709_s30 = scalar_lea.vmem %s1024_s7, 256  ;;  %s832_s0 = smov [#allocation7]  }
  0x62   : > { %p710_p0 = scmp.ne.s32.totalorder %s1024_s7, %s709_s30  ;;  %s714_s11 = sshll.u32 %s832_s0, 4  ;;  %s715_s11 = int_to_ptr.vmem [resolvable:$false] %s714_s11 }
  0x63   : > { %s716_s8 = scalar_lea.vmem %s715_s11, 512  ;;  %p717_p11 = scmp.lt.s32.totalorder %s1024_s7, %s715_s11 }
  0x64   : > { %p712_p8 = pnand %p710_p0, %p945_p2  ;;  %p718_p4 = scmp.lt.s32.totalorder %s716_s8, %s709_s30 }
  0x66   : > { %p713_p10 = pneg %p712_p8  ;;  %p719_p3 = por %p718_p4, %p717_p11 }
  0x68   : > { %p720_p5 = pnand %p719_p3, %p713_p10 }
  0x6a   : > { %723 = shalt.err (!%p720_p5)
}
  0x6b   : > { %584 = dma.hbm_to_vmem [thread:$0]  (!%p924_p13), %s1021_s20, 256, %s1024_s7, %s939_s12, %s1212_s23, %s1212_s23, %s1211_s13  }
  0x6c   : > { %p1213_p2 = scmp.ne.s32.totalorder %s1210_s10, 0 }
  0x6d   : > { %s1054_s14 = sand.u32 (!%p1213_p2), 1, %s818_s16   ;;  %p1214_p1 = scmp.ne.s32.totalorder (!%p1213_p2), %s1202_s25, 0 }
  0x6e   : > { %240 = sbr.rel (%p1213_p2) target bundleno = 173 (0xad), region = 32  ;;  %s1057_s28 = sshll.u32 (!%p1213_p2), %s1054_s14, 4 }
  0x6f   : > { %s243_s5 = scalar_lea.sflag (!%p1213_p2), [#allocation3], %s1054_s14  ;;  %s246_s1 = scalar_lea.vmem (!%p1213_p2), [#allocation2], %s1057_s28 }
  0x75   : > { %797 = dma.done.wait (%p1214_p1), %s243_s5, 256  }
  0x76   : > { %799 = vsyncadd (%p1214_p1), %s243_s5, 4294967040  ;;  %s251_s12 = sand.u32 1, %s883_s19   ;;  %s255_s13 = scalar_lea.vmem [#allocation5], %s1057_s28 }
  0x77   : > { %s252_s10 = scalar_lea.sflag [#allocation6], %s251_s12 }
  0x78   : > { %801 = dma.done.wait (%p1214_p1), %s252_s10, 512  }
  0x79   : > { %803 = vsyncadd (%p1214_p1), %s252_s10, 4294966784  ;;  %v1071_v0 = vld [vmem:[%s246_s1] sm:$0xff]  ;;  %s264_s23 = scalar_lea.vmem [#allocation7], %s1057_s28  ;;  %v1078_v5 = vld [vmem:[%s246_s1 + $0x8] sm:$0xff]  ;;  %s296_s25 = scalar_lea.vmem [#allocation8], %s1057_s28 }
  0x7a   : > { %v1073_v1 = vld [vmem:[%s255_s13] sm:$0xff]  ;;  %v1080_v6 = vld [vmem:[%s255_s13 + $0x8] sm:$0xff]  ;;  %s370_s20 = sshll.u32 %s296_s25, 4  ;;  %s563_s7 = sshll.u32 %s883_s19, 8  ;;  %s1088_s20 = int_to_ptr.vmem [resolvable:$true] %s370_s20 }
  0x7b   : > { %v313_v2 = vld [vmem:[%s264_s23] sm:$0xff]  ;;  %v319_v4 = vsub.f32 %v1073_v1, %v1071_v0  ;;  %v314_v7 = vld [vmem:[%s264_s23 + $0x8] sm:$0xff]  ;;  %vm337_vm0 = vcmp.lt.f32.partialorder %v1073_v1, 0.0  ;;  %v320_v9 = vsub.f32 %v1080_v6, %v1078_v5  ;;  %vm338_vm1 = vcmp.lt.f32.partialorder %v1080_v6, 0.0  ;;  %s1097_s9 = scalar_lea.hbm %s1192_s3, %s563_s7  ;;  %s352_s29 = scalar_lea.sflag [#allocation4], %s1054_s14 }
  0x7c   : > { %v315_v3 = vmax.f32 %v313_v2, 0.0  ;;  %v316_v8 = vmax.f32 %v314_v7, 0.0  ;;  %s724_s30 = scalar_lea.vmem %s1088_s20, 256  ;;  %p1215_p7 = scmp.ne.s32.totalorder %s1203_s26, 0 }
  0x7d   : > { %630 = vrcp.f32 %v319_v4  ;;  %p725_p13 = scmp.ne.s32.totalorder %s1088_s20, %s724_s30  ;;  %s833_s0 = smov [#allocation8]  }
  0x7e   : > { %v317_v10 = vmin.f32 %v315_v3, 1.0  ;;  %v318_v11 = vmin.f32 %v316_v8, 1.0  ;;  %632 = vrcp.f32 %v320_v9  ;;  %s728_s11 = sshll.u32 %s833_s0, 4  ;;  %s729_s11 = int_to_ptr.vmem [resolvable:$false] %s728_s11 }
  0x7f   : > { %p726_p6 = pnand %p725_p13, %p1215_p7  ;;  %s730_s8 = scalar_lea.vmem %s729_s11, 512 }
  0x80   : > { %v339_v12 = vsel %vm337_vm0, 0.0, %v317_v10  ;;  %v340_v14 = vsel %vm338_vm1, 0.0, %v318_v11  ;;  %p731_p12 = scmp.lt.s32.totalorder %s1088_s20, %s729_s11  ;;  %p732_p0 = scmp.lt.s32.totalorder %s730_s8, %s724_s30 }
  0x81   : > { %v341_v13 = vmul.f32 %v339_v12, %v1071_v0  ;;  %v342_v15 = vmul.f32 %v340_v14, %v1078_v5  ;;  %p727_p9 = pneg %p726_p6 }
  0x82   : > { %p733_p8 = por %p732_p0, %p731_p12 }
  0x83   : > { %347 = vst [vmem:[%s296_s25] sm:$0xff] %v341_v13  ;;  %348 = vst [vmem:[%s296_s25 + $0x8] sm:$0xff] %v342_v15 }
  0x84   : > { %p734_p10 = pnand %p733_p8, %p727_p9 }
  0x86   : > { %737 = shalt.err (!%p734_p10)
}
  0x87   : > { %s738_s5 = scalar_lea.hbm %s1097_s9, 256  ;;  %s742_s10 = scalar_lea.hbm %s1192_s3, 512 }
  0x88   : > { %p739_p11 = scmp.ne.s32.totalorder %s1097_s9, %s738_s5  ;;  %p743_p5 = scmp.lt.u32.totalorder %s1097_s9, %s1192_s3 }
  0x89   : > { %p744_p2 = scmp.lt.u32.totalorder %s742_s10, %s738_s5  ;;  %p746_p13 = scmp.lt.u32.totalorder %s738_s5, %s1097_s9 }
  0x8a   : > { %p740_p4 = pnand %p739_p11, %p1215_p7 }
  0x8b   : > { %p745_p1 = por %p744_p2, %p743_p5 }
  0x8c   : > { %p741_p3 = pneg %p740_p4 }
  0x8d   : > { %p747_p6 = por %p746_p13, %p745_p1 }
  0x8f   : > { %p748_p9 = pnand %p747_p6, %p741_p3 }
  0x91   : > { %751 = shalt.err (!%p748_p9)
}
  0x92   : > { %s834_s25 = smov 128   ;;  %s835_s6 = smov 8   ;;  %v631_v16 = vpop.eup %630  ;;  %vm327_vm2 = vcmp.gt.f32.partialorder %v1071_v0, 0.0  ;;  %vm328_vm3 = vcmp.gt.f32.partialorder %v1078_v5, 0.0 }
  0x93   : > { %571 = dma.vmem_to_hbm [thread:$0]  (%p1215_p7), %s1088_s20, 256, %s1097_s9, %s352_s29, %s834_s25, %s834_s25, %s835_s6   ;;  %v633_v17 = vpop.eup %632  ;;  %v322_v18 = vmul.f32 %v631_v16, %v1073_v1 }
  0x94   : > { %v324_v19 = vmul.f32 %v633_v17, %v1080_v6  ;;  %s303_s20 = scalar_lea.vmem [#allocation9], %s1057_s28  ;;  %s1142_s30 = scalar_lea.hbm %s1193_s4, %s563_s7 }
  0x95   : > { %v325_v20 = vmax.f32 %v322_v18, 0.0  ;;  %s386_s22 = sshll.u32 %s303_s20, 4  ;;  %s357_s28 = scalar_lea.sflag [#allocation10], %s1054_s14  ;;  %s1135_s22 = int_to_ptr.vmem [resolvable:$true] %s386_s22 }
  0x96   : > { %v326_v21 = vmax.f32 %v324_v19, 0.0  ;;  %s752_s0 = scalar_lea.vmem %s1135_s22, 256  ;;  %s836_s11 = smov [#allocation9]  }
  0x97   : > { %v329_v22 = vmul.f32 %v325_v20, %v1071_v0  ;;  %v335_v23 = vsel %vm327_vm2, 1.0, %v325_v20  ;;  %p753_p12 = scmp.ne.s32.totalorder %s1135_s22, %s752_s0  ;;  %s756_s8 = sshll.u32 %s836_s11, 4  ;;  %s757_s8 = int_to_ptr.vmem [resolvable:$false] %s756_s8 }
  0x98   : > { %v343_v24 = vmul.f32 %v335_v23, %v1073_v1  ;;  %v330_v25 = vmul.f32 %v326_v21, %v1078_v5  ;;  %v336_v26 = vsel %vm328_vm3, 1.0, %v326_v21  ;;  %s758_s5 = scalar_lea.vmem %s757_s8, 512  ;;  %p759_p10 = scmp.lt.s32.totalorder %s1135_s22, %s757_s8 }
  0x99   : > { %v331_v27 = vsub.f32 0.0, %v329_v22  ;;  %v344_v28 = vmul.f32 %v336_v26, %v1080_v6  ;;  %p754_p0 = pnand %p753_p12, %p1215_p7  ;;  %p760_p11 = scmp.lt.s32.totalorder %s758_s5, %s752_s0 }
  0x9a   : > { %v332_v29 = vsub.f32 0.0, %v330_v25 }
  0x9b   : > { %v333_v30 = vsel %vm327_vm2, 0.0, %v331_v27  ;;  %p755_p8 = pneg %p754_p0  ;;  %p761_p4 = por %p760_p11, %p759_p10 }
  0x9c   : > { %v345_v31 = vadd.f32 %v343_v24, %v333_v30  ;;  %v334_v32 = vsel %vm328_vm3, 0.0, %v332_v29 }
  0x9d   : > { %v346_v33 = vadd.f32 %v344_v28, %v334_v32  ;;  %p762_p3 = pnand %p761_p4, %p755_p8 }
  0x9e   : > { %349 = vst [vmem:[%s303_s20] sm:$0xff] %v345_v31 }
  0x9f   : > { %350 = vst [vmem:[%s303_s20 + $0x8] sm:$0xff] %v346_v33 }
  0xa0   : > { %765 = shalt.err (!%p762_p3)
}
  0xa1   : > { %s766_s19 = scalar_lea.hbm %s1142_s30, 256  ;;  %s770_s12 = scalar_lea.hbm %s1193_s4, 512 }
  0xa2   : > { %p767_p5 = scmp.ne.s32.totalorder %s1142_s30, %s766_s19  ;;  %p771_p13 = scmp.lt.u32.totalorder %s1142_s30, %s1193_s4 }
  0xa3   : > { %p772_p6 = scmp.lt.u32.totalorder %s770_s12, %s766_s19  ;;  %p774_p12 = scmp.lt.u32.totalorder %s766_s19, %s1142_s30 }
  0xa4   : > { %p768_p2 = pnand %p767_p5, %p1215_p7 }
  0xa5   : > { %p773_p9 = por %p772_p6, %p771_p13 }
  0xa6   : > { %p769_p1 = pneg %p768_p2 }
  0xa7   : > { %p775_p0 = por %p774_p12, %p773_p9 }
  0xa9   : > { %p776_p8 = pnand %p775_p0, %p769_p1 }
  0xab   : > { %779 = shalt.err (!%p776_p8)
}
  0xac   : > { %572 = dma.vmem_to_hbm [thread:$0]  (%p1215_p7), %s1135_s22, 256, %s1142_s30, %s357_s28, %s834_s25, %s834_s25, %s835_s6  }
  0xad PF: > { %s401_s23 = sand.u32 1, %s814_s15   ;;  %p1216_p10 = scmp.ne.s32.totalorder %s1204_s27, 0 }
  0xae   : > { %p1217_p11 = scmp.ge.s32.totalorder %s826_s18, 2  ;;  %s402_s20 = scalar_lea.sflag [#allocation4], %s401_s23 }
  0xb0   : > { %p586_p4 = pnand %p1217_p11, %p1216_p10 }
  0xb2   : > { %805 = dma.done.wait (!%p586_p4), %s402_s20, 256  }
  0xb3   : > { %807 = vsyncadd (!%p586_p4), %s402_s20, 4294967040  ;;  %s411_s26 = scalar_lea.sflag [#allocation10], %s401_s23 }
  0xb4   : > { %809 = dma.done.wait (!%p586_p4), %s411_s26, 256  }
  0xb5   : > { %811 = vsyncadd (!%p586_p4), %s411_s26, 4294967040  ;;  %p24_p7 = scmp.ge.s32.totalorder %s887_s21, 4   ;;  %s1218_s15 = smov %s818_s16 }
  0xb6   : > { %s1219_s16 = smov %s822_s17  ;;  %s1220_s17 = smov %s899_s24 }
  0xb7   : > { %s1221_s18 = smov %s887_s21  ;;  %26 = sbr.rel (!%p24_p7) target bundleno = 12 (0xc), region = 118 }
  0xbe   :  { %416 = vsyncpa [#allocation3], 1 }
  0xbf   :  { %418 = vsyncpa [#allocation3 + $0x1], 1 }
  0xc0   :  { %419 = vsyncpa [#allocation6], 1 }
  0xc1   :  { %421 = vsyncpa [#allocation6 + $0x1], 1 }
  0xc2   :  { %422 = vsyncpa [#allocation4], 1 }
  0xc3   :  { %424 = vsyncpa [#allocation4 + $0x1], 1 }
  0xc4   :  { %425 = vsyncpa [#allocation10], 1 }
  0xc5   :  { %427 = vsyncpa [#allocation10 + $0x1], 1 }

</bundles_post_ra>
